<compile_context>
chip_gen: v6e
topology: v6e:2x2x1
jax: 0.10.0
libtpu: 0.0.40
codegen_flags: <defaults>
</compile_context>

<pallas_src>
import functools

import jax
import jax.numpy as jnp
import numpy as np
from jax.experimental import pallas as pl
from jax.experimental.pallas import tpu as pltpu


def _round_up(x: int, m: int) -> int:
    return (x + m - 1) // m * m


def _pad2(a: jax.Array, rows: int, cols: int) -> jax.Array:
    r, c = a.shape
    return jnp.pad(a, ((0, rows - r), (0, cols - c)))


# ----------------------------------------------------------------------------
# Kernels
# ----------------------------------------------------------------------------
def _discrete_kernel(x_ref, w1_ref, b1_ref, w2_ref, b2_ref, o_ref,
                     *, act_dim: int, inv_temp: float):
    """softmax( (relu(x@W1+b1) @ W2 + b2) / T ) over the (unpadded) action lanes."""
    x = x_ref[...]
    h = jnp.dot(x, w1_ref[...], preferred_element_type=jnp.float32) + b1_ref[...]
    h = jnp.maximum(h, 0.0)
    logits = jnp.dot(h, w2_ref[...], preferred_element_type=jnp.float32) + b2_ref[...]
    logits = logits * inv_temp
    # Mask lane-padded action entries so they do not contribute to softmax.
    lane = jax.lax.broadcasted_iota(jnp.int32, logits.shape, dimension=1)
    logits = jnp.where(lane < act_dim, logits, -jnp.inf)
    m = jnp.max(logits, axis=-1, keepdims=True)
    e = jnp.exp(logits - m)                      # EUP; padded lanes -> exp(-inf)=0
    s = jnp.sum(e, axis=-1, keepdims=True)
    o_ref[...] = (e / s).astype(o_ref.dtype)


def _continuous_kernel(x_ref,
                       wm1_ref, bm1_ref, wm2_ref, bm2_ref,
                       ws1_ref, bs1_ref, ws2_ref, bs2_ref,
                       mean_ref, std_ref):
    """mean = MLP_mean(x); std = exp(MLP_log_std(x)). Both heads fused."""
    x = x_ref[...]

    hm = jnp.dot(x, wm1_ref[...], preferred_element_type=jnp.float32) + bm1_ref[...]
    hm = jnp.maximum(hm, 0.0)
    mean = jnp.dot(hm, wm2_ref[...], preferred_element_type=jnp.float32) + bm2_ref[...]
    mean_ref[...] = mean.astype(mean_ref.dtype)

    hs = jnp.dot(x, ws1_ref[...], preferred_element_type=jnp.float32) + bs1_ref[...]
    hs = jnp.maximum(hs, 0.0)
    log_std = jnp.dot(hs, ws2_ref[...], preferred_element_type=jnp.float32) + bs2_ref[...]
    std_ref[...] = jnp.exp(log_std).astype(std_ref.dtype)


# ----------------------------------------------------------------------------
# Wrappers (padding, BlockSpecs, pallas_call)
# ----------------------------------------------------------------------------
def actor_discrete_forward(x, w1, b1, w2, b2, temperature, *, max_tb=256):
    batch, state_dim = x.shape
    hidden_dim = w1.shape[1]
    act_dim = w2.shape[1]

    s_pad = _round_up(state_dim, 128)
    h_pad = _round_up(hidden_dim, 128)
    a_pad = _round_up(act_dim, 128)
    tb = min(max_tb, _round_up(batch, 8))        # tiny batch -> single grid point
    b_pad = _round_up(batch, tb)

    f32 = jnp.float32
    x_p = _pad2(x.astype(f32), b_pad, s_pad)
    w1_p = _pad2(w1.astype(f32), s_pad, h_pad)
    b1_p = _pad2(b1.astype(f32).reshape(1, -1), 1, h_pad)
    w2_p = _pad2(w2.astype(f32), h_pad, a_pad)
    b2_p = _pad2(b2.astype(f32).reshape(1, -1), 1, a_pad)

    kernel = functools.partial(_discrete_kernel, act_dim=act_dim,
                               inv_temp=float(1.0 / temperature))
    out = pl.pallas_call(
        kernel,
        out_shape=jax.ShapeDtypeStruct((b_pad, a_pad), f32),
        grid=(b_pad // tb,),
        in_specs=[
            pl.BlockSpec((tb, s_pad), lambda i: (i, 0)),       # x: tiled on batch
            pl.BlockSpec((s_pad, h_pad), lambda i: (0, 0)),    # W1: resident
            pl.BlockSpec((1, h_pad), lambda i: (0, 0)),        # b1: resident
            pl.BlockSpec((h_pad, a_pad), lambda i: (0, 0)),    # W2: resident
            pl.BlockSpec((1, a_pad), lambda i: (0, 0)),        # b2: resident
        ],
        out_specs=pl.BlockSpec((tb, a_pad), lambda i: (i, 0)),
        compiler_params=pltpu.CompilerParams(
            dimension_semantics=("parallel",)),
    )(x_p, w1_p, b1_p, w2_p, b2_p)
    return out[:batch, :act_dim]


def actor_continuous_forward(x, wm1, bm1, wm2, bm2, ws1, bs1, ws2, bs2, *,
                             max_tb=256):
    batch, state_dim = x.shape
    hidden_dim = wm1.shape[1]
    act_dim = wm2.shape[1]

    s_pad = _round_up(state_dim, 128)
    h_pad = _round_up(hidden_dim, 128)
    a_pad = _round_up(act_dim, 128)
    tb = min(max_tb, _round_up(batch, 8))
    b_pad = _round_up(batch, tb)

    f32 = jnp.float32
    x_p = _pad2(x.astype(f32), b_pad, s_pad)
    wm1_p = _pad2(wm1.astype(f32), s_pad, h_pad)
    bm1_p = _pad2(bm1.astype(f32).reshape(1, -1), 1, h_pad)
    wm2_p = _pad2(wm2.astype(f32), h_pad, a_pad)
    bm2_p = _pad2(bm2.astype(f32).reshape(1, -1), 1, a_pad)
    ws1_p = _pad2(ws1.astype(f32), s_pad, h_pad)
    bs1_p = _pad2(bs1.astype(f32).reshape(1, -1), 1, h_pad)
    ws2_p = _pad2(ws2.astype(f32), h_pad, a_pad)
    bs2_p = _pad2(bs2.astype(f32).reshape(1, -1), 1, a_pad)

    resident2 = lambda shape: pl.BlockSpec(shape, lambda i: (0, 0))
    mean_p, std_p = pl.pallas_call(
        _continuous_kernel,
        out_shape=(jax.ShapeDtypeStruct((b_pad, a_pad), f32),
                   jax.ShapeDtypeStruct((b_pad, a_pad), f32)),
        grid=(b_pad // tb,),
        in_specs=[
            pl.BlockSpec((tb, s_pad), lambda i: (i, 0)),       # x: tiled on batch
            resident2((s_pad, h_pad)), resident2((1, h_pad)),  # mean-head W1, b1
            resident2((h_pad, a_pad)), resident2((1, a_pad)),  # mean-head W2, b2
            resident2((s_pad, h_pad)), resident2((1, h_pad)),  # log_std-head W1, b1
            resident2((h_pad, a_pad)), resident2((1, a_pad)),  # log_std-head W2, b2
        ],
        out_specs=(pl.BlockSpec((tb, a_pad), lambda i: (i, 0)),
                   pl.BlockSpec((tb, a_pad), lambda i: (i, 0))),
        compiler_params=pltpu.CompilerParams(
            dimension_semantics=("parallel",)),
    )(x_p, wm1_p, bm1_p, wm2_p, bm2_p, ws1_p, bs1_p, ws2_p, bs2_p)
    return mean_p[:batch, :act_dim], std_p[:batch, :act_dim]


# ----------------------------------------------------------------------------
# Pure-JAX references (for correctness check)
# ----------------------------------------------------------------------------
def _ref_mlp(x, w1, b1, w2, b2):
    h = jnp.maximum(x @ w1 + b1.reshape(1, -1), 0.0)
    return h @ w2 + b2.reshape(1, -1)


# ----------------------------------------------------------------------------
if __name__ == "__main__":
    batch, state_dim, hidden_dim, act_dim = 2, 17, 64, 6
    temperature = 1.5

    key = jax.random.PRNGKey(0)
    ks = jax.random.split(key, 14)

    def init_linear(kw, kb, fan_in, fan_out):
        bound = 1.0 / float(np.sqrt(fan_in))
        w = jax.random.uniform(kw, (fan_in, fan_out), jnp.float32, -bound, bound)
        b = jax.random.uniform(kb, (fan_out,), jnp.float32, -bound, bound)
        return w, b

    x = jax.random.normal(ks[0], (batch, state_dim), jnp.float32)

    # ---- discrete actor: softmax(MLP(x) / T) -------------------------------
    w1, b1 = init_linear(ks[1], ks[2], state_dim, hidden_dim)
    w2, b2 = init_linear(ks[3], ks[4], hidden_dim, act_dim)

    probs = jax.block_until_ready(
        actor_discrete_forward(x, w1, b1, w2, b2, temperature))
    probs_ref = jax.nn.softmax(_ref_mlp(x, w1, b1, w2, b2) / temperature, axis=-1)
    np.testing.assert_allclose(np.asarray(probs), np.asarray(probs_ref),
                               rtol=1e-5, atol=1e-5)

    # ---- continuous actor: (mean, exp(log_std)) ----------------------------
    wm1, bm1 = init_linear(ks[5], ks[6], state_dim, hidden_dim)
    wm2, bm2 = init_linear(ks[7], ks[8], hidden_dim, act_dim)
    ws1, bs1 = init_linear(ks[9], ks[10], state_dim, hidden_dim)
    ws2, bs2 = init_linear(ks[11], ks[12], hidden_dim, act_dim)

    mean, std = jax.block_until_ready(
        actor_continuous_forward(x, wm1, bm1, wm2, bm2, ws1, bs1, ws2, bs2))
    mean_ref = _ref_mlp(x, wm1, bm1, wm2, bm2)
    std_ref = jnp.exp(_ref_mlp(x, ws1, bs1, ws2, bs2))
    np.testing.assert_allclose(np.asarray(mean), np.asarray(mean_ref),
                               rtol=1e-5, atol=1e-5)
    np.testing.assert_allclose(np.asarray(std), np.asarray(std_ref),
                               rtol=1e-5, atol=1e-5)

    print("KERNEL_OK")
</pallas_src>

<mosaic_0001>
module attributes {stable_mosaic.version = 11 : i64} {
  func.func @_discrete_kernel(%arg0: i32, %arg1: memref<8x128xf32, #tpu.memory_space<vmem>>, %arg2: memref<128x128xf32, #tpu.memory_space<vmem>>, %arg3: memref<1x128xf32, #tpu.memory_space<vmem>>, %arg4: memref<128x128xf32, #tpu.memory_space<vmem>>, %arg5: memref<1x128xf32, #tpu.memory_space<vmem>>, %arg6: memref<8x128xf32, #tpu.memory_space<vmem>>) attributes {dimension_semantics = [#tpu.dimension_semantics<parallel>], iteration_bounds = array<i64: 1>, scalar_prefetch = 0 : i64, scratch_operands = 0 : i64, tpu.core_type = #tpu.core_type<tc>, window_params = [{transform_indices = @transform_0, window_bounds = array<i64: 8, 128>}, {pipeline_mode = #tpu.pipeline_mode<synchronous>, transform_indices = @transform_1, window_bounds = array<i64: 128, 128>}, {pipeline_mode = #tpu.pipeline_mode<synchronous>, transform_indices = @transform_2, window_bounds = array<i64: 1, 128>}, {pipeline_mode = #tpu.pipeline_mode<synchronous>, transform_indices = @transform_3, window_bounds = array<i64: 128, 128>}, {pipeline_mode = #tpu.pipeline_mode<synchronous>, transform_indices = @transform_4, window_bounds = array<i64: 1, 128>}, {transform_indices = @transform_5, window_bounds = array<i64: 8, 128>}]} {
    %c0 = arith.constant 0 : index
    %c0_0 = arith.constant 0 : index
    %0 = vector.load %arg1[%c0, %c0_0] : memref<8x128xf32, #tpu.memory_space<vmem>>, vector<8x128xf32>
    %c0_1 = arith.constant 0 : index
    %c0_2 = arith.constant 0 : index
    %1 = vector.load %arg2[%c0_1, %c0_2] : memref<128x128xf32, #tpu.memory_space<vmem>>, vector<128x128xf32>
    %cst = arith.constant dense<0.000000e+00> : vector<8x128xf32>
    %2 = tpu.matmul %0, %1, %cst {dimension_numbers = #tpu.dot_dimension_numbers<[1], [0], [0], [1], [0, 0, 1, 1], [], []>} : vector<8x128xf32>, vector<128x128xf32>, vector<8x128xf32> -> vector<8x128xf32>
    %c0_3 = arith.constant 0 : index
    %c0_4 = arith.constant 0 : index
    %3 = vector.load %arg3[%c0_3, %c0_4] : memref<1x128xf32, #tpu.memory_space<vmem>>, vector<1x128xf32>
    %4 = vector.broadcast %3 : vector<1x128xf32> to vector<8x128xf32>
    %5 = arith.addf %2, %4 : vector<8x128xf32>
    %cst_5 = arith.constant 0.000000e+00 : f32
    %6 = vector.broadcast %cst_5 : f32 to vector<8x128xf32>
    %7 = arith.maximumf %5, %6 : vector<8x128xf32>
    %c0_6 = arith.constant 0 : index
    %c0_7 = arith.constant 0 : index
    %8 = vector.load %arg4[%c0_6, %c0_7] : memref<128x128xf32, #tpu.memory_space<vmem>>, vector<128x128xf32>
    %cst_8 = arith.constant dense<0.000000e+00> : vector<8x128xf32>
    %9 = tpu.matmul %7, %8, %cst_8 {dimension_numbers = #tpu.dot_dimension_numbers<[1], [0], [0], [1], [0, 0, 1, 1], [], []>} : vector<8x128xf32>, vector<128x128xf32>, vector<8x128xf32> -> vector<8x128xf32>
    %c0_9 = arith.constant 0 : index
    %c0_10 = arith.constant 0 : index
    %10 = vector.load %arg5[%c0_9, %c0_10] : memref<1x128xf32, #tpu.memory_space<vmem>>, vector<1x128xf32>
    %11 = vector.broadcast %10 : vector<1x128xf32> to vector<8x128xf32>
    %12 = arith.addf %9, %11 : vector<8x128xf32>
    %cst_11 = arith.constant 0.666666686 : f32
    %13 = vector.broadcast %cst_11 : f32 to vector<8x128xf32>
    %14 = arith.mulf %12, %13 : vector<8x128xf32>
    %15 = tpu.iota {dimensions = array<i32: 1>} : vector<8x128xi32>
    %c6_i32 = arith.constant 6 : i32
    %16 = vector.broadcast %c6_i32 : i32 to vector<8x128xi32>
    %17 = arith.cmpi slt, %15, %16 : vector<8x128xi32>
    %cst_12 = arith.constant 0xFF800000 : f32
    %18 = vector.broadcast %cst_12 : f32 to vector<8x128xf32>
    %19 = arith.select %17, %14, %18 : vector<8x128xi1>, vector<8x128xf32>
    %cst_13 = arith.constant dense<0xFF800000> : vector<8xf32>
    %20 = vector.multi_reduction <maximumf>, %19, %cst_13 [1] : vector<8x128xf32> to vector<8xf32>
    %21 = vector.shape_cast %20 : vector<8xf32> to vector<8x1xf32>
    %22 = vector.broadcast %21 : vector<8x1xf32> to vector<8x128xf32>
    %23 = arith.subf %19, %22 : vector<8x128xf32>
    %24 = math.exp %23 : vector<8x128xf32>
    %cst_14 = arith.constant dense<0.000000e+00> : vector<8xf32>
    %25 = vector.multi_reduction <add>, %24, %cst_14 [1] : vector<8x128xf32> to vector<8xf32>
    %26 = vector.shape_cast %25 : vector<8xf32> to vector<8x1xf32>
    %27 = vector.broadcast %26 : vector<8x1xf32> to vector<8x128xf32>
    %28 = arith.divf %24, %27 : vector<8x128xf32>
    %c0_15 = arith.constant 0 : index
    %c0_16 = arith.constant 0 : index
    %29 = vector.load %arg6[%c0_15, %c0_16] : memref<8x128xf32, #tpu.memory_space<vmem>>, vector<8x128xf32>
    tpu.vector_store %arg6[%c0_15, %c0_16], %28 {strides = array<i32>} : memref<8x128xf32, #tpu.memory_space<vmem>>, vector<8x128xf32>,
    return
  }
  func.func @transform_0(%arg0: i32) -> (i32, i32) {
    %c0_i32 = arith.constant 0 : i32
    %c0_i32_0 = arith.constant 0 : i32
    return %arg0, %c0_i32 : i32, i32
  }
  func.func @transform_1(%arg0: i32) -> (i32, i32) {
    %c0_i32 = arith.constant 0 : i32
    %c0_i32_0 = arith.constant 0 : i32
    %c0_i32_1 = arith.constant 0 : i32
    return %c0_i32, %c0_i32_0 : i32, i32
  }
  func.func @transform_2(%arg0: i32) -> (i32, i32) {
    %c0_i32 = arith.constant 0 : i32
    %c0_i32_0 = arith.constant 0 : i32
    %c0_i32_1 = arith.constant 0 : i32
    return %c0_i32, %c0_i32_0 : i32, i32
  }
  func.func @transform_3(%arg0: i32) -> (i32, i32) {
    %c0_i32 = arith.constant 0 : i32
    %c0_i32_0 = arith.constant 0 : i32
    %c0_i32_1 = arith.constant 0 : i32
    return %c0_i32, %c0_i32_0 : i32, i32
  }
  func.func @transform_4(%arg0: i32) -> (i32, i32) {
    %c0_i32 = arith.constant 0 : i32
    %c0_i32_0 = arith.constant 0 : i32
    %c0_i32_1 = arith.constant 0 : i32
    return %c0_i32, %c0_i32_0 : i32, i32
  }
  func.func @transform_5(%arg0: i32) -> (i32, i32) {
    %c0_i32 = arith.constant 0 : i32
    %c0_i32_0 = arith.constant 0 : i32
    return %arg0, %c0_i32 : i32, i32
  }
}

</mosaic_0001>

<bundles_post_ra>
// kernel: tpu_custom_call.1
= control target key start
LH: loop header
LB: loop body
LE: loop exit
PB: predicated region body
PF: predicated region fallthrough
CT: control target
= control target key end

     0   :  { %10 = vsyncpa [#allocation3], 0  ;;  %s573_s0 = inlined_call_operand.hbm [shape: f32[8,128], index: 0, kind: input, shape index: {}]   ;;  %s574_s1 = inlined_call_operand.hbm [shape: f32[128,128], index: 1, kind: input, shape index: {}]   ;;  %s575_s2 = inlined_call_operand.vmem [shape: f32[1,128], index: 2, kind: input, shape index: {}]   ;;  %s576_s3 = inlined_call_operand.hbm [shape: f32[128,128], index: 3, kind: input, shape index: {}]   ;;  %s577_s4 = inlined_call_operand.vmem [shape: f32[1,128], index: 4, kind: input, shape index: {}]   ;;  %s578_s5 = inlined_call_operand.hbm [shape: f32[8,128], index: 5, kind: output, shape index: {}]  }
   0x1   :  { %11 = vsyncpa [#allocation6], 0 }
   0x2   :  { %12 = vsyncpa [#allocation4], 0  ;;  %s483_s18 = smov [#allocation5]  }
   0x3   :  { %s28_s19 = sshll.u32 %s483_s18, 4  ;;  %s29_s19 = int_to_ptr.vmem [resolvable:$true] %s28_s19 }
   0x4   :  { %s405_s20 = scalar_lea.vmem %s29_s19, 2048  ;;  %p410_p1 = scmp.lt.s32.totalorder %s29_s19, %s29_s19 }
   0x5   :  { %p406_p0 = scmp.ne.s32.totalorder %s29_s19, %s405_s20  ;;  %p411_p2 = scmp.lt.s32.totalorder %s405_s20, %s405_s20 }
   0x7   :  { %p412_p3 = por %p411_p2, %p410_p1 }
   0x9   :  { %p413_p4 = pnand %p412_p3, %p406_p0 }
   0xb   :  { %416 = shalt.err (!%p413_p4)
}
   0xc   :  { %s484_s21 = smov 128   ;;  %s485_s22 = smov 8  }
   0xd   :  { %34 = dma.hbm_to_vmem [thread:$0]  %s574_s1, 2048, %s29_s19, [#allocation6], %s484_s21, %s484_s21, %s485_s22  }
   0xe   :  { %s486_s25 = smov [#allocation2]   ;;  %s487_s27 = smov [#allocation7]  }
   0xf   :  { %s19_s26 = sshll.u32 %s486_s25, 4  ;;  %s42_s28 = sshll.u32 %s487_s27, 4  ;;  %s20_s26 = int_to_ptr.vmem [resolvable:$true] %s19_s26  ;;  %s43_s28 = int_to_ptr.vmem [resolvable:$true] %s42_s28 }
  0x10   :  { %s425_s29 = scalar_lea.vmem %s20_s26, 128  ;;  %p430_p6 = scmp.lt.s32.totalorder %s20_s26, %s20_s26 }
  0x11   :  { %p426_p5 = scmp.ne.s32.totalorder %s20_s26, %s425_s29  ;;  %p431_p7 = scmp.lt.s32.totalorder %s425_s29, %s425_s29 }
  0x13   :  { %p432_p8 = por %p431_p7, %p430_p6 }
  0x15   :  { %p433_p9 = pnand %p432_p8, %p426_p5 }
  0x17   :  { %436 = shalt.err (!%p433_p9)
}
  0x18   :  { %22 = dma.hbm_to_vmem [thread:$0]  %s573_s0, 128, %s20_s26, [#allocation3]  }
  0x19   :  { %s445_s7 = scalar_lea.vmem %s43_s28, 2048  ;;  %p450_p11 = scmp.lt.s32.totalorder %s43_s28, %s43_s28 }
  0x1a   :  { %p446_p10 = scmp.ne.s32.totalorder %s43_s28, %s445_s7  ;;  %p451_p12 = scmp.lt.s32.totalorder %s445_s7, %s445_s7 }
  0x1c   :  { %p452_p13 = por %p451_p12, %p450_p11 }
  0x1e   :  { %p453_p0 = pnand %p452_p13, %p446_p10 }
  0x20   :  { %456 = shalt.err (!%p453_p0)
}
  0x21   :  { %48 = dma.hbm_to_vmem [thread:$0]  %s576_s3, 2048, %s43_s28, [#allocation6], %s484_s21, %s484_s21, %s485_s22  }
  0x22   :  { %477 = dma.done.wait [#allocation3], 128  }
  0x23   :  { %478 = vsyncadd [#allocation3], 4294967168 }
  0x24   :  { %479 = dma.done.wait [#allocation6], 4096  }
  0x25   :  { %480 = vsyncadd [#allocation6], 4294963200  ;;  %v488_v0 = vmov 0.0   ;;  %vm489_vm0 = vmmov 0   ;;  %v76_v1 = vld [vmem:[#allocation5 + $0x78] sm:$0xff]  ;;  %v75_v2 = vld [vmem:[#allocation5 + $0x70] sm:$0xff]  ;;  %v249_v39 = vlaneseq }
  0x26   :  { %315 = vmatprep.subr.mxu0 %v488_v0  ;;  %347 = vmatprep.mubr.msk.f32.mxu0 %vm489_vm0, %v488_v0  ;;  %v74_v3 = vld [vmem:[#allocation5 + $0x68] sm:$0xff]  ;;  %v73_v4 = vld [vmem:[#allocation5 + $0x60] sm:$0xff]  ;;  %v170_v5 = vld [vmem:[#allocation7 + $0x78] sm:$0xff] }
  0x27   :  { %350 = vmatprep.subr.mxu1 %v488_v0  ;;  %382 = vmatprep.mubr.msk.f32.mxu1 %vm489_vm0, %v488_v0  ;;  %v72_v6 = vld [vmem:[#allocation5 + $0x58] sm:$0xff]  ;;  %v169_v7 = vld [vmem:[#allocation7 + $0x70] sm:$0xff]  ;;  %v168_v8 = vld [vmem:[#allocation7 + $0x68] sm:$0xff]  ;;  %v250_v41 = vand.u32 127, %v249_v39 }
  0x28   :  { %316 = vmatpush3.msra.mxu0 %v76_v1  ;;  %351 = vmatpush3.msra.mxu1 %v170_v5  ;;  %v71_v9 = vld [vmem:[#allocation5 + $0x50] sm:$0xff]  ;;  %v167_v10 = vld [vmem:[#allocation7 + $0x60] sm:$0xff]  ;;  %v70_v11 = vld [vmem:[#allocation5 + $0x48] sm:$0xff] }
  0x29   :  { %317 = vmatprep.subr.mxu0 %v488_v0  ;;  %352 = vmatprep.subr.mxu1 %v488_v0  ;;  %v166_v12 = vld [vmem:[#allocation7 + $0x58] sm:$0xff]  ;;  %v69_v13 = vld [vmem:[#allocation5 + $0x40] sm:$0xff]  ;;  %v165_v14 = vld [vmem:[#allocation7 + $0x50] sm:$0xff]  ;;  %vm251_vm1 = vcmp.lt.s32.totalorder %v250_v41, 6 }
  0x2a   :  { %318 = vmatpush3.msra.mxu0 %v75_v2  ;;  %353 = vmatpush3.msra.mxu1 %v169_v7  ;;  %v68_v15 = vld [vmem:[#allocation5 + $0x38] sm:$0xff]  ;;  %v164_v16 = vld [vmem:[#allocation7 + $0x48] sm:$0xff]  ;;  %v67_v17 = vld [vmem:[#allocation5 + $0x30] sm:$0xff] }
  0x2b   :  { %319 = vmatprep.subr.mxu0 %v488_v0  ;;  %354 = vmatprep.subr.mxu1 %v488_v0  ;;  %v163_v18 = vld [vmem:[#allocation7 + $0x40] sm:$0xff]  ;;  %v66_v19 = vld [vmem:[#allocation5 + $0x28] sm:$0xff]  ;;  %v162_v20 = vld [vmem:[#allocation7 + $0x38] sm:$0xff] }
  0x2c   :  { %320 = vmatpush3.msra.mxu0 %v74_v3  ;;  %355 = vmatpush3.msra.mxu1 %v168_v8  ;;  %v65_v21 = vld [vmem:[#allocation5 + $0x20] sm:$0xff]  ;;  %v161_v22 = vld [vmem:[#allocation7 + $0x30] sm:$0xff]  ;;  %v64_v23 = vld [vmem:[#allocation5 + $0x18] sm:$0xff] }
  0x2d   :  { %321 = vmatprep.subr.mxu0 %v488_v0  ;;  %356 = vmatprep.subr.mxu1 %v488_v0  ;;  %v160_v24 = vld [vmem:[#allocation7 + $0x28] sm:$0xff]  ;;  %v63_v25 = vld [vmem:[#allocation5 + $0x10] sm:$0xff]  ;;  %v159_v26 = vld [vmem:[#allocation7 + $0x20] sm:$0xff] }
  0x2e   :  { %322 = vmatpush3.msra.mxu0 %v73_v4  ;;  %357 = vmatpush3.msra.mxu1 %v167_v10  ;;  %v62_v27 = vld [vmem:[#allocation5 + $0x8] sm:$0xff]  ;;  %v158_v28 = vld [vmem:[#allocation7 + $0x18] sm:$0xff]  ;;  %v61_v29 = vld [vmem:[#allocation5] sm:$0xff] }
  0x2f   :  { %323 = vmatprep.subr.mxu0 %v488_v0  ;;  %358 = vmatprep.subr.mxu1 %v488_v0  ;;  %v60_v30 = vld [vmem:[#allocation2] sm:$0xff]  ;;  %v157_v31 = vld [vmem:[#allocation7 + $0x10] sm:$0xff]  ;;  %v156_v32 = vld [vmem:[#allocation7 + $0x8] sm:$0xff] }
  0x30   :  { %324 = vmatpush3.msra.mxu0 %v72_v6  ;;  %359 = vmatpush3.msra.mxu1 %v166_v12  ;;  %v155_v33 = vld [vmem:[#allocation7] sm:$0xff]  ;;  %v279_v34 = vld [vmem:[%s575_s2] ss:$0 sm:$0xff]  ;;  %s490_s2 = smov [#allocation8]  }
  0x31   :  { %325 = vmatprep.subr.mxu0 %v488_v0  ;;  %360 = vmatprep.subr.mxu1 %v488_v0  ;;  %v280_v40 = vld [vmem:[%s577_s4] ss:$0 sm:$0xff]  ;;  %s269_s11 = sshll.u32 %s490_s2, 4  ;;  %s270_s11 = int_to_ptr.vmem [resolvable:$true] %s269_s11 }
  0x32   :  { %326 = vmatpush3.msra.mxu0 %v71_v9  ;;  %361 = vmatpush3.msra.mxu1 %v165_v14  ;;  %s457_s4 = scalar_lea.vmem %s270_s11, 128  ;;  %p462_p2 = scmp.lt.s32.totalorder %s270_s11, %s270_s11 }
  0x33   :  { %327 = vmatprep.subr.mxu0 %v488_v0  ;;  %362 = vmatprep.subr.mxu1 %v488_v0  ;;  %p458_p1 = scmp.ne.s32.totalorder %s270_s11, %s457_s4  ;;  %p463_p3 = scmp.lt.s32.totalorder %s457_s4, %s457_s4 }
  0x34   :  { %328 = vmatpush3.msra.mxu0 %v70_v11  ;;  %363 = vmatpush3.msra.mxu1 %v164_v16 }
  0x35   :  { %329 = vmatprep.subr.mxu0 %v488_v0  ;;  %364 = vmatprep.subr.mxu1 %v488_v0  ;;  %p464_p4 = por %p463_p3, %p462_p2 }
  0x36   :  { %330 = vmatpush3.msra.mxu0 %v69_v13  ;;  %365 = vmatpush3.msra.mxu1 %v163_v18 }
  0x37   :  { %331 = vmatprep.subr.mxu0 %v488_v0  ;;  %366 = vmatprep.subr.mxu1 %v488_v0  ;;  %p465_p5 = pnand %p464_p4, %p458_p1 }
  0x38   :  { %332 = vmatpush3.msra.mxu0 %v68_v15  ;;  %367 = vmatpush3.msra.mxu1 %v162_v20 }
  0x39   :  { %333 = vmatprep.subr.mxu0 %v488_v0  ;;  %368 = vmatprep.subr.mxu1 %v488_v0 }
  0x3a   :  { %334 = vmatpush3.msra.mxu0 %v67_v17  ;;  %369 = vmatpush3.msra.mxu1 %v161_v22 }
  0x3b   :  { %335 = vmatprep.subr.mxu0 %v488_v0  ;;  %370 = vmatprep.subr.mxu1 %v488_v0 }
  0x3c   :  { %336 = vmatpush3.msra.mxu0 %v66_v19  ;;  %371 = vmatpush3.msra.mxu1 %v160_v24 }
  0x3d   :  { %337 = vmatprep.subr.mxu0 %v488_v0  ;;  %372 = vmatprep.subr.mxu1 %v488_v0 }
  0x3e   :  { %338 = vmatpush3.msra.mxu0 %v65_v21  ;;  %373 = vmatpush3.msra.mxu1 %v159_v26 }
  0x3f   :  { %339 = vmatprep.subr.mxu0 %v488_v0  ;;  %374 = vmatprep.subr.mxu1 %v488_v0 }
  0x40   :  { %340 = vmatpush3.msra.mxu0 %v64_v23  ;;  %375 = vmatpush3.msra.mxu1 %v158_v28 }
  0x41   :  { %341 = vmatprep.subr.mxu0 %v488_v0  ;;  %376 = vmatprep.subr.mxu1 %v488_v0 }
  0x42   :  { %342 = vmatpush3.msra.mxu0 %v63_v25  ;;  %377 = vmatpush3.msra.mxu1 %v157_v31 }
  0x43   :  { %343 = vmatprep.subr.mxu0 %v488_v0  ;;  %378 = vmatprep.subr.mxu1 %v488_v0 }
  0x44   :  { %344 = vmatpush3.msra.mxu0 %v62_v27  ;;  %379 = vmatpush3.msra.mxu1 %v156_v32 }
  0x45   :  { %345 = vmatprep.subr.mxu0 %v488_v0  ;;  %380 = vmatprep.subr.mxu1 %v488_v0 }
  0x46   :  { %346 = vmatpush3.msra.mxu0 %v61_v29  ;;  %381 = vmatpush3.msra.mxu1 %v155_v33 }
  0x47   :  { %348 = vmatmul.mubr.f32.vlgmr.msra.gmra.mxu0 %v60_v30 }
 0x107   :  { %v150_v35 = vpop.f32.mrf.mxu0 }
 0x108   :  { %v151_v36 = vadd.f32 %v279_v34, %v150_v35 }
 0x109   :  { %v349_v37 = vpop.f32.mrf.mxu0 }
 0x10a   :  { %v154_v38 = vmax.f32 %v151_v36, 0.0 }
 0x10c   :  { %383 = vmatmul.mubr.f32.vlgmr.msra.gmra.mxu1 %v154_v38 }
 0x1cc   :  { %v244_v42 = vpop.f32.mrf.mxu1 }
 0x1cd   :  { %v245_v43 = vadd.f32 %v280_v40, %v244_v42 }
 0x1ce   :  { %v384_v44 = vpop.f32.mrf.mxu1 }
 0x1cf   :  { %v248_v45 = vmul.f32 0.6666667, %v245_v43 }
 0x1d1   :  { %v252_v46 = vsel %vm251_vm1, %v248_v45, -inf }
 0x1d2   :  { %253 = vmax.xlane.f32.xlu0 %v252_v46 }
 0x25b   :  { %v254_v47 = vpop.xlane.xlu0 %253 }
 0x25c   :  { %v255_v48 = vsub.f32 %v252_v46, %v254_v47 }
 0x25e   :  { %v256_v49 = vmul.f32 1.442695, %v255_v48 }
 0x260   :  { %393 = vpow2.f32 %v256_v49 }
 0x26d   :  { %v394_v50 = vpop.eup %393 }
 0x26e   :  { %258 = vadd.xlane.f32.xlu0 %v394_v50 }
 0x2f7   :  { %v259_v51 = vpop.xlane.xlu0 %258 }
 0x2f8   :  { %395 = vrcp.f32 %v259_v51 }
 0x305   :  { %v396_v52 = vpop.eup %395 }
 0x306   :  { %v261_v53 = vmul.f32 %v396_v52, %v394_v50 }
 0x308   :  { %262 = vst [vmem:[#allocation8] sm:$0xff] %v261_v53 }
 0x309   :  { %468 = shalt.err (!%p465_p5)
}
 0x30a   :  { %272 = dma.vmem_to_hbm [thread:$0]  %s270_s11, 128, %s578_s5, [#allocation4]  }
 0x30b   :  { %481 = dma.done.wait [#allocation4], 128  }
 0x30c   :  { %482 = vsyncadd [#allocation4], 4294967168 }
 0x30d   :  { %276 = vsyncpa [#allocation3], 1 }
 0x30e   :  { %277 = vsyncpa [#allocation6], 1 }
 0x30f   :  { %278 = vsyncpa [#allocation4], 1 }

</bundles_post_ra>
